<compile_context>
chip_gen: v6e
topology: v6e:2x2x1
jax: 0.10.0
libtpu: 0.0.40
codegen_flags: <defaults>
</compile_context>

<pallas_src>
import functools

import jax
import jax.numpy as jnp
from jax.experimental import pallas as pl
from jax.experimental.pallas import tpu as pltpu


def _pe_add_kernel(x_ref, pe_ref, o_ref, *, d_model, tile_b):
    # x_ref/o_ref: (tile_s, tile_b * d_model)   pe_ref: (tile_s, d_model)
    pe = pe_ref[...]
    for b in range(tile_b):           # unrolled static slices; no pe temporary
        lo = b * d_model
        o_ref[:, lo:lo + d_model] = x_ref[:, lo:lo + d_model] + pe


def _choose_tiles(S, B, D, itemsize):
    """Pick (tile_s, tile_b): ~4 MiB x blocks, dtype-aware sublane rounding,
    >=2 parallel grid steps for non-tiny inputs, lane tiling for huge B*D."""
    sublane = max(8, 32 // itemsize)          # 8 f32, 16 bf16, 32 int8/fp8
    target_blk = 4 * 1024 * 1024              # ~4 MiB x block (mem-bound sweet spot)
    max_blk = 8 * 1024 * 1024                 # hard cap (double-buffered fits all gens)

    # Lane tiling in whole-batch units only (keeps pe reuse a static slice and
    # the lane width a multiple of 128 when D % 128 == 0).
    tile_b = B
    if D % 128 == 0:
        while tile_b > 1 and sublane * tile_b * D * itemsize > max_blk:
            tile_b = pl.cdiv(tile_b, 2)

    row_bytes = tile_b * D * itemsize
    if S <= sublane:
        tile_s = S                            # full dim: always a legal block
    else:
        rows = min(S, max(sublane, target_blk // max(1, row_bytes)))
        tile_s = max(sublane, (rows // sublane) * sublane)
        if tile_s >= S:
            tile_s = S

    # Ensure >=2 parallel grid steps for v7x's two TensorCores when the input
    # is big enough that splitting pays for the per-step overhead.
    total_bytes = S * B * D * itemsize
    n_steps = pl.cdiv(S, tile_s) * pl.cdiv(B, tile_b)
    if total_bytes > (2 << 20) and n_steps < 2 and S >= 2 * sublane:
        half = pl.cdiv(S, 2)
        tile_s = max(sublane, pl.cdiv(half, sublane) * sublane)

    return tile_s, tile_b, sublane


def learnable_positional_encoding(x, pe):
    """x: (S, B, D), pe: (max_len, D). Returns x + pe[:S] broadcast over batch."""
    S, B, D = x.shape
    max_len, D_pe = pe.shape
    assert D_pe == D, "pe feature dim must match x"
    assert S <= max_len, "sequence length exceeds positional table max_len"
    assert x.dtype == pe.dtype

    itemsize = jnp.dtype(x.dtype).itemsize
    BD = B * D

    # Free, contiguous collapses in the wrapper (layout plumbing, not compute).
    x2 = x.reshape(S, BD)
    pe_s = pe[:S]                             # matches PyTorch `pe[position]`

    tile_s, tile_b, _ = _choose_tiles(S, B, D, itemsize)
    tile_bd = tile_b * D
    grid = (pl.cdiv(S, tile_s), pl.cdiv(B, tile_b))

    # Accurate double-buffered VMEM budget: 2 * (x_in + out + pe) + 25% headroom.
    x_blk = tile_s * tile_bd * itemsize
    pe_blk = tile_s * D * itemsize
    vmem_limit = int(2 * (2 * x_blk + pe_blk) * 1.25)
    vmem_limit = max(8 * 1024 * 1024, min(48 * 1024 * 1024, vmem_limit))

    out2 = pl.pallas_call(
        functools.partial(_pe_add_kernel, d_model=D, tile_b=tile_b),
        out_shape=jax.ShapeDtypeStruct((S, BD), x.dtype),
        grid_spec=pltpu.PrefetchScalarGridSpec(
            num_scalar_prefetch=0,
            grid=grid,
            in_specs=[
                # x tile: (tile_s, tile_b*D) — lane-dense, full sublane occupancy.
                pl.BlockSpec((tile_s, tile_bd), lambda i, j: (i, j)),
                # pe tile: (tile_s, D) — tiny operand, reused across batch tiles.
                pl.BlockSpec((tile_s, D), lambda i, j: (i, 0)),
            ],
            out_specs=pl.BlockSpec((tile_s, tile_bd), lambda i, j: (i, j)),
        ),
        compiler_params=pltpu.CompilerParams(
            dimension_semantics=("parallel", "parallel"),
            vmem_limit_bytes=vmem_limit,
        ),
    )(x2, pe_s)

    return out2.reshape(S, B, D)


if __name__ == "__main__":
    # Small, lane-friendly transformer sizes (B * d_model = 256, multiple of 128).
    d_model = 128
    max_len = 64
    seq_len = 16
    batch = 2

    key = jax.random.PRNGKey(0)
    k_pe, k_x = jax.random.split(key)

    # Deterministic param init mirroring nn.init.normal_(pe, mean=0, std=0.02).
    pe = 0.02 * jax.random.normal(k_pe, (max_len, d_model), dtype=jnp.float32)
    # Input x: (seq_len, batch, d_model) — PyTorch layout (x.size(0) == seq).
    x = jax.random.normal(k_x, (seq_len, batch, d_model), dtype=jnp.float32)

    # Reference (computed before the kernel call).
    ref = x + pe[:seq_len][:, None, :]

    out = learnable_positional_encoding(x, pe)
    out = jax.block_until_ready(out)

    assert out.shape == x.shape and out.dtype == x.dtype
    assert jnp.allclose(out, ref, atol=1e-6, rtol=1e-6), "mismatch vs reference"

    print("KERNEL_OK")
</pallas_src>

<mosaic_0001>
module attributes {stable_mosaic.version = 11 : i64} {
  func.func @_pe_add_kernel(%arg0: i32, %arg1: i32, %arg2: memref<16x256xf32, #tpu.memory_space<vmem>>, %arg3: memref<16x128xf32, #tpu.memory_space<vmem>>, %arg4: memref<16x256xf32, #tpu.memory_space<vmem>>) attributes {dimension_semantics = [#tpu.dimension_semantics<parallel>, #tpu.dimension_semantics<parallel>], iteration_bounds = array<i64: 1, 1>, scalar_prefetch = 0 : i64, scratch_operands = 0 : i64, tpu.core_type = #tpu.core_type<tc>, window_params = [{transform_indices = @transform_0, window_bounds = array<i64: 16, 256>}, {transform_indices = @transform_1, window_bounds = array<i64: 16, 128>}, {transform_indices = @transform_2, window_bounds = array<i64: 16, 256>}]} {
    %c0 = arith.constant 0 : index
    %c0_0 = arith.constant 0 : index
    %0 = vector.load %arg3[%c0, %c0_0] : memref<16x128xf32, #tpu.memory_space<vmem>>, vector<16x128xf32>
    %c0_1 = arith.constant 0 : index
    %c0_2 = arith.constant 0 : index
    %1 = vector.load %arg2[%c0_1, %c0_2] : memref<16x256xf32, #tpu.memory_space<vmem>>, vector<16x128xf32>
    %2 = arith.addf %1, %0 : vector<16x128xf32>
    %c0_3 = arith.constant 0 : index
    %c0_4 = arith.constant 0 : index
    %3 = vector.load %arg4[%c0_3, %c0_4] : memref<16x256xf32, #tpu.memory_space<vmem>>, vector<16x128xf32>
    tpu.vector_store %arg4[%c0_3, %c0_4], %2 {strides = array<i32>} : memref<16x256xf32, #tpu.memory_space<vmem>>, vector<16x128xf32>,
    %c0_5 = arith.constant 0 : index
    %c128 = arith.constant 128 : index
    %4 = vector.load %arg2[%c0_5, %c128] : memref<16x256xf32, #tpu.memory_space<vmem>>, vector<16x128xf32>
    %5 = arith.addf %4, %0 : vector<16x128xf32>
    %c0_6 = arith.constant 0 : index
    %c128_7 = arith.constant 128 : index
    %6 = vector.load %arg4[%c0_6, %c128_7] : memref<16x256xf32, #tpu.memory_space<vmem>>, vector<16x128xf32>
    tpu.vector_store %arg4[%c0_6, %c128_7], %5 {strides = array<i32>} : memref<16x256xf32, #tpu.memory_space<vmem>>, vector<16x128xf32>,
    return
  }
  func.func @transform_0(%arg0: i32, %arg1: i32) -> (i32, i32) {
    %c0_i32 = arith.constant 0 : i32
    return %arg0, %arg1 : i32, i32
  }
  func.func @transform_1(%arg0: i32, %arg1: i32) -> (i32, i32) {
    %c0_i32 = arith.constant 0 : i32
    %c0_i32_0 = arith.constant 0 : i32
    return %arg0, %c0_i32 : i32, i32
  }
  func.func @transform_2(%arg0: i32, %arg1: i32) -> (i32, i32) {
    %c0_i32 = arith.constant 0 : i32
    return %arg0, %arg1 : i32, i32
  }
}

</mosaic_0001>

<bundles_post_ra>
// kernel: tpu_custom_call.1
= control target key start
LH: loop header
LB: loop body
LE: loop exit
PB: predicated region body
PF: predicated region fallthrough
CT: control target
= control target key end

     0   :  { %7 = vsyncpa [#allocation3], 0  ;;  %s182_s0 = inlined_call_operand.hbm [shape: f32[16,256], index: 0, kind: input, shape index: {}]   ;;  %s183_s1 = inlined_call_operand.hbm [shape: f32[16,128], index: 1, kind: input, shape index: {}]   ;;  %s184_s2 = inlined_call_operand.hbm [shape: f32[16,256], index: 2, kind: output, shape index: {}]  }
   0x1   :  { %8 = vsyncpa [#allocation6], 0 }
   0x2   :  { %9 = vsyncpa [#allocation4], 0  ;;  %s145_s9 = smov [#allocation2]  }
   0x3   :  { %s15_s10 = sshll.u32 %s145_s9, 4  ;;  %s16_s10 = int_to_ptr.vmem [resolvable:$true] %s15_s10 }
   0x4   :  { %s87_s11 = scalar_lea.vmem %s16_s10, 512  ;;  %p92_p1 = scmp.lt.s32.totalorder %s16_s10, %s16_s10 }
   0x5   :  { %p88_p0 = scmp.ne.s32.totalorder %s16_s10, %s87_s11  ;;  %p93_p2 = scmp.lt.s32.totalorder %s87_s11, %s87_s11 }
   0x7   :  { %p94_p3 = por %p93_p2, %p92_p1 }
   0x9   :  { %p95_p4 = pnand %p94_p3, %p88_p0 }
   0xb   :  { %98 = shalt.err (!%p95_p4)
}
   0xc   :  { %s146_s12 = smov 256   ;;  %s147_s13 = smov 16  }
   0xd   :  { %21 = dma.hbm_to_vmem [thread:$0]  %s182_s0, 512, %s16_s10, [#allocation3], %s146_s12, %s146_s12, %s147_s13  }
   0xe   :  { %s148_s16 = smov [#allocation5]  }
   0xf   :  { %s27_s17 = sshll.u32 %s148_s16, 4  ;;  %s28_s17 = int_to_ptr.vmem [resolvable:$true] %s27_s17 }
  0x10   :  { %s107_s18 = scalar_lea.vmem %s28_s17, 256  ;;  %p112_p6 = scmp.lt.s32.totalorder %s28_s17, %s28_s17 }
  0x11   :  { %p108_p5 = scmp.ne.s32.totalorder %s28_s17, %s107_s18  ;;  %p113_p7 = scmp.lt.s32.totalorder %s107_s18, %s107_s18 }
  0x13   :  { %p114_p8 = por %p113_p7, %p112_p6 }
  0x15   :  { %p115_p9 = pnand %p114_p8, %p108_p5 }
  0x17   :  { %118 = shalt.err (!%p115_p9)
}
  0x18   :  { %s149_s19 = smov 128   ;;  %s150_s20 = smov 8  }
  0x19   :  { %33 = dma.hbm_to_vmem [thread:$0]  %s183_s1, 256, %s28_s17, [#allocation6], %s149_s19, %s149_s19, %s150_s20  }
  0x1a   :  { %139 = dma.done.wait [#allocation3], 512  }
  0x1b   :  { %140 = vsyncadd [#allocation3], 4294966784 }
  0x1c   :  { %141 = dma.done.wait [#allocation6], 256  }
  0x1d   :  { %142 = vsyncadd [#allocation6], 4294967040  ;;  %s151_s0 = smov [#allocation7]   ;;  %v40_v0 = vld [vmem:[#allocation5] sm:$0xff]  ;;  %v41_v2 = vld [vmem:[#allocation5 + $0x8] sm:$0xff] }
  0x1e   :  { %s59_s23 = sshll.u32 %s151_s0, 4  ;;  %v42_v1 = vld [vmem:[#allocation2] sm:$0xff]  ;;  %v43_v4 = vld [vmem:[#allocation2 + $0x10] sm:$0xff]  ;;  %v48_v5 = vld [vmem:[#allocation2 + $0x8] sm:$0xff]  ;;  %s60_s23 = int_to_ptr.vmem [resolvable:$true] %s59_s23 }
  0x1f   :  { %v44_v3 = vadd.f32 %v42_v1, %v40_v0  ;;  %v49_v6 = vld [vmem:[#allocation2 + $0x18] sm:$0xff]  ;;  %v45_v7 = vadd.f32 %v43_v4, %v41_v2  ;;  %v50_v8 = vadd.f32 %v48_v5, %v40_v0  ;;  %s119_s1 = scalar_lea.vmem %s60_s23, 512  ;;  %p124_p11 = scmp.lt.s32.totalorder %s60_s23, %s60_s23 }
  0x20   :  { %v51_v9 = vadd.f32 %v49_v6, %v41_v2  ;;  %p120_p10 = scmp.ne.s32.totalorder %s60_s23, %s119_s1  ;;  %p125_p12 = scmp.lt.s32.totalorder %s119_s1, %s119_s1 }
  0x21   :  { %46 = vst [vmem:[#allocation7] sm:$0xff] %v44_v3  ;;  %47 = vst [vmem:[#allocation7 + $0x10] sm:$0xff] %v45_v7 }
  0x22   :  { %52 = vst [vmem:[#allocation7 + $0x8] sm:$0xff] %v50_v8  ;;  %53 = vst [vmem:[#allocation7 + $0x18] sm:$0xff] %v51_v9  ;;  %p126_p13 = por %p125_p12, %p124_p11 }
  0x24   :  { %p127_p0 = pnand %p126_p13, %p120_p10 }
  0x26   :  { %130 = shalt.err (!%p127_p0)
}
  0x27   :  { %65 = dma.vmem_to_hbm [thread:$0]  %s60_s23, 512, %s184_s2, [#allocation4], %s146_s12, %s146_s12, %s147_s13  }
  0x28   :  { %143 = dma.done.wait [#allocation4], 512  }
  0x29   :  { %144 = vsyncadd [#allocation4], 4294966784 }
  0x2a   :  { %69 = vsyncpa [#allocation3], 1 }
  0x2b   :  { %70 = vsyncpa [#allocation6], 1 }
  0x2c   :  { %71 = vsyncpa [#allocation4], 1 }

</bundles_post_ra>
